<compile_context>
chip_gen: v6e
topology: v6e:2x2x1
jax: 0.10.0
libtpu: 0.0.40
codegen_flags: <defaults>
</compile_context>

<pallas_src>
import math

import jax
import jax.numpy as jnp
from jax import lax
from jax.experimental import pallas as pl
from jax.experimental.pallas import tpu as pltpu


BLOCK_TYPES = {k: k for k in ("CNN", "TCN", "GRU", "LSTM", "TRANSFORMER", "MLP", "NONE")}

# MXU operand dtype.  Accumulation is always f32 (preferred_element_type).
MATMUL_DTYPE = jnp.bfloat16


def _vmem_limit_bytes():
    """Generation-aware scoped-VMEM limit: ~75% of physical, capped at 100 MiB."""
    try:
        cap = getattr(pltpu.get_tpu_info(), "vmem_capacity_bytes", 128 * 1024 * 1024)
    except Exception:  # pragma: no cover - e.g. interpret mode / unknown chip
        cap = 128 * 1024 * 1024
    return int(min(cap * 3 // 4, 100 * 1024 * 1024))


_VMEM_LIMIT = _vmem_limit_bytes()


def _mm(a, b):
    return jnp.dot(a.astype(MATMUL_DTYPE), b.astype(MATMUL_DTYPE),
                   preferred_element_type=jnp.float32)


def _round_up(n, m):
    return ((n + m - 1) // m) * m


def _const_spec(p):
    # Full-array block, constant block index (no re-DMA across grid steps).
    return pl.BlockSpec(p.shape, lambda *args, n=p.ndim: (0,) * n)


# ----------------------------------------------------------------------------
# Parameter initializers (deterministic, PyTorch-style uniform bounds)
# ----------------------------------------------------------------------------
def _uniform(key, shape, bound):
    return jax.random.uniform(key, shape, jnp.float32, minval=-bound, maxval=bound)


def _init_conv1d(key, c_in, c_out, k):
    k1, k2 = jax.random.split(key)
    bound = 1.0 / math.sqrt(c_in * k)
    w = _uniform(k1, (k, c_in, c_out), bound)            # (K, Cin, Cout), tap-major
    b = _uniform(k2, (1, c_out), bound)
    return w.astype(MATMUL_DTYPE), b                     # bf16 weights, f32 bias


def _init_linear(key, d_in, d_out):
    k1, k2 = jax.random.split(key)
    bound = 1.0 / math.sqrt(d_in)
    return _uniform(k1, (d_in, d_out), bound), _uniform(k2, (1, d_out), bound)


def _init_rnn_layer(key, d_in, hidden, gates):
    k1, k2, k3, k4 = jax.random.split(key, 4)
    bound = 1.0 / math.sqrt(hidden)
    w_ih = _uniform(k1, (d_in, gates * hidden), bound)
    w_hh = _uniform(k2, (hidden, gates * hidden), bound)
    b_ih = _uniform(k3, (1, gates * hidden), bound)
    b_hh = _uniform(k4, (1, gates * hidden), bound)
    return w_ih, w_hh, b_ih, b_hh


def _init_transformer_layer(key, d, n_ff):
    ks = jax.random.split(key, 6)
    wq, bq = _init_linear(ks[0], d, d)
    wk, bk = _init_linear(ks[1], d, d)
    wv, bv = _init_linear(ks[2], d, d)
    wo, bo = _init_linear(ks[3], d, d)
    w1, b1 = _init_linear(ks[4], d, n_ff)
    w2, b2 = _init_linear(ks[5], n_ff, d)
    g1 = jnp.ones((1, d), jnp.float32); be1 = jnp.zeros((1, d), jnp.float32)
    g2 = jnp.ones((1, d), jnp.float32); be2 = jnp.zeros((1, d), jnp.float32)
    return (wq, bq, wk, bk, wv, bv, wo, bo, w1, b1, w2, b2, g1, be1, g2, be2)


# ----------------------------------------------------------------------------
# CNN / TCN: fused conv stack, per-tap matmul accumulation (channels-last)
# ----------------------------------------------------------------------------
def conv_stack_relu(x, params, K):
    """Fused Conv1d+ReLU stack.  x: (B, L, Cin); params: [(w (K,Cin,Cout) bf16, b (1,Cout))]."""
    B, L, Cin = x.shape
    pad = K // 2
    Cout = params[0][0].shape[2]
    n_layers = len(params)
    L_out = L
    for _ in range(n_layers):
        L_out = L_out + 2 * pad - K + 1
    flat = [a for wb in params for a in wb]

    def kernel(*refs):
        x_ref, o_ref = refs[0], refs[-1]
        prefs = refs[1:-1]
        h = x_ref[0]                                            # (L, Cin) f32
        for li in range(n_layers):
            w_ref, b_ref = prefs[2 * li], prefs[2 * li + 1]
            Lc, C = h.shape
            if pad > 0:                                         # in-kernel halo (sublane axis)
                zp = jnp.zeros((pad, C), jnp.float32)
                hp = jnp.concatenate([zp, h, zp], axis=0)
            else:
                hp = h
            Lo = Lc + 2 * pad - K + 1
            # Per-tap matmul accumulation on sublane-shifted views (no lane concat).
            acc = _mm(hp[0:Lo, :], w_ref[0])
            for j in range(1, K):
                acc = acc + _mm(hp[j:j + Lo, :], w_ref[j])
            h = jnp.maximum(acc + b_ref[...], 0.0)
        o_ref[0] = h

    # TODO(synk): add an L tile axis with halo (parallel) for very long sequences on v7x.
    in_specs = [pl.BlockSpec((1, L, Cin), lambda bi: (bi, 0, 0))]
    in_specs += [_const_spec(p) for p in flat]
    return pl.pallas_call(
        kernel,
        out_shape=jax.ShapeDtypeStruct((B, L_out, Cout), jnp.float32),
        grid=(B,),
        in_specs=in_specs,
        out_specs=pl.BlockSpec((1, L_out, Cout), lambda bi: (bi, 0, 0)),
        compiler_params=pltpu.CompilerParams(
            dimension_semantics=("parallel",), vmem_limit_bytes=_VMEM_LIMIT),
    )(x, *flat)


# ----------------------------------------------------------------------------
# MLP: fused Linear+ReLU stack, 128-lane-padded features
# ----------------------------------------------------------------------------
def mlp_stack_relu(x2d, params):
    """Fused Linear+ReLU stack on flattened rows.  x2d: (N, Din); features pre-padded to 128."""
    N, Din = x2d.shape
    Dp = params[-1][0].shape[1]
    n_layers = len(params)
    tile_target = 1024 if _VMEM_LIMIT >= 64 * 1024 * 1024 else 512
    TILE = tile_target if N >= tile_target else _round_up(max(N, 1), 8)
    Np = _round_up(N, TILE)
    if Np != N:
        x2d = jnp.pad(x2d, ((0, Np - N), (0, 0)))
    flat = [a for wb in params for a in wb]

    def kernel(*refs):
        x_ref, o_ref = refs[0], refs[-1]
        prefs = refs[1:-1]
        h = x_ref[...]
        for li in range(n_layers):
            w_ref, b_ref = prefs[2 * li], prefs[2 * li + 1]
            h = jnp.maximum(_mm(h, w_ref[...]) + b_ref[...], 0.0)
        o_ref[...] = h

    in_specs = [pl.BlockSpec((TILE, Din), lambda i: (i, 0))]
    in_specs += [_const_spec(p) for p in flat]
    out = pl.pallas_call(
        kernel,
        out_shape=jax.ShapeDtypeStruct((Np, Dp), jnp.float32),
        grid=(Np // TILE,),
        in_specs=in_specs,
        out_specs=pl.BlockSpec((TILE, Dp), lambda i: (i, 0)),
        compiler_params=pltpu.CompilerParams(
            dimension_semantics=("parallel",), vmem_limit_bytes=_VMEM_LIMIT),
    )(x2d, *flat)
    return out[:N]


# ----------------------------------------------------------------------------
# GRU / LSTM: fused gate matmuls, sublane-padded batch, bounded time chunks
# ----------------------------------------------------------------------------
def _pick_time_chunk(T, Bp, target_rows=1024):
    """Bounded chunk (no full-T fallback); T is padded up to a multiple of the chunk."""
    return max(1, min(T, target_rows // Bp))


def gru_layer(x_tbd, w_ih, u_all, b_in, b_nh):
    """Single GRU layer.  x_tbd: (T, B, Din) -> (T, B, H).  PyTorch gate order [r, z, n]."""
    T, B, Din = x_tbd.shape
    H = u_all.shape[0]
    Bp = _round_up(max(B, 1), 8)
    Tc = _pick_time_chunk(T, Bp)
    Tp = _round_up(T, Tc)
    xp = jnp.pad(x_tbd, ((0, Tp - T), (0, Bp - B), (0, 0)))
    x2d = xp.reshape(Tp * Bp, Din)
    wparams = [w_ih, u_all, b_in, b_nh]

    def kernel(x_ref, w_r, u_r, bin_r, bnh_r, y_ref, h_scr, g_scr):
        @pl.when(pl.program_id(0) == 0)
        def _():
            h_scr[...] = jnp.zeros_like(h_scr)

        # Hoisted input projection: ONE (Tc*Bp, Din) x (Din, 3H) matmul, biases folded.
        g_scr[...] = _mm(x_ref[...], w_r[...]) + bin_r[...]

        def step(t, carry):
            h_prev = h_scr[...]                               # (Bp, H) f32
            row = pl.ds(pl.multiple_of(t * Bp, 8), Bp)
            g = g_scr[row, :]                                 # (Bp, 3H) pre-activation
            hg = _mm(h_prev, u_r[...])                        # ONE fused hidden matmul
            r = jax.nn.sigmoid(g[:, 0:H] + hg[:, 0:H])
            z = jax.nn.sigmoid(g[:, H:2 * H] + hg[:, H:2 * H])
            n = jnp.tanh(g[:, 2 * H:3 * H] + r * (hg[:, 2 * H:3 * H] + bnh_r[...]))
            h_new = (1.0 - z) * n + z * h_prev
            h_scr[...] = h_new
            y_ref[row, :] = h_new
            return carry

        lax.fori_loop(0, Tc, step, 0, unroll=min(8, Tc))

    in_specs = [pl.BlockSpec((Tc * Bp, Din), lambda t: (t, 0))]
    in_specs += [_const_spec(p) for p in wparams]
    y2d = pl.pallas_call(
        kernel,
        out_shape=jax.ShapeDtypeStruct((Tp * Bp, H), jnp.float32),
        grid=(Tp // Tc,),
        in_specs=in_specs,
        out_specs=pl.BlockSpec((Tc * Bp, H), lambda t: (t, 0)),
        scratch_shapes=[pltpu.VMEM((Bp, H), jnp.float32),
                        pltpu.VMEM((Tc * Bp, 3 * H), jnp.float32)],
        compiler_params=pltpu.CompilerParams(
            dimension_semantics=("arbitrary",), vmem_limit_bytes=_VMEM_LIMIT),
    )(x2d, *wparams)
    return y2d.reshape(Tp, Bp, H)[:T, :B]


def lstm_layer(x_tbd, w_ih, u_all, b_all):
    """Single LSTM layer.  x_tbd: (T, B, Din) -> (T, B, H).  PyTorch gate order [i, f, g, o]."""
    T, B, Din = x_tbd.shape
    H = u_all.shape[0]
    Bp = _round_up(max(B, 1), 8)
    Tc = _pick_time_chunk(T, Bp)
    Tp = _round_up(T, Tc)
    xp = jnp.pad(x_tbd, ((0, Tp - T), (0, Bp - B), (0, 0)))
    x2d = xp.reshape(Tp * Bp, Din)
    wparams = [w_ih, u_all, b_all]

    def kernel(x_ref, w_r, u_r, b_r, y_ref, h_scr, c_scr, g_scr):
        @pl.when(pl.program_id(0) == 0)
        def _():
            h_scr[...] = jnp.zeros_like(h_scr)
            c_scr[...] = jnp.zeros_like(c_scr)

        g_scr[...] = _mm(x_ref[...], w_r[...]) + b_r[...]     # (Tc*Bp, 4H)

        def step(t, carry):
            h_prev = h_scr[...]
            c_prev = c_scr[...]
            row = pl.ds(pl.multiple_of(t * Bp, 8), Bp)
            g = g_scr[row, :] + _mm(h_prev, u_r[...])          # ONE fused hidden matmul
            i = jax.nn.sigmoid(g[:, 0:H])
            f = jax.nn.sigmoid(g[:, H:2 * H])
            gg = jnp.tanh(g[:, 2 * H:3 * H])
            o = jax.nn.sigmoid(g[:, 3 * H:4 * H])
            c_new = f * c_prev + i * gg
            h_new = o * jnp.tanh(c_new)
            c_scr[...] = c_new
            h_scr[...] = h_new
            y_ref[row, :] = h_new
            return carry

        lax.fori_loop(0, Tc, step, 0, unroll=min(8, Tc))

    in_specs = [pl.BlockSpec((Tc * Bp, Din), lambda t: (t, 0))]
    in_specs += [_const_spec(p) for p in wparams]
    y2d = pl.pallas_call(
        kernel,
        out_shape=jax.ShapeDtypeStruct((Tp * Bp, H), jnp.float32),
        grid=(Tp // Tc,),
        in_specs=in_specs,
        out_specs=pl.BlockSpec((Tc * Bp, H), lambda t: (t, 0)),
        scratch_shapes=[pltpu.VMEM((Bp, H), jnp.float32),
                        pltpu.VMEM((Bp, H), jnp.float32),
                        pltpu.VMEM((Tc * Bp, 4 * H), jnp.float32)],
        compiler_params=pltpu.CompilerParams(
            dimension_semantics=("arbitrary",), vmem_limit_bytes=_VMEM_LIMIT),
    )(x2d, *wparams)
    return y2d.reshape(Tp, Bp, H)[:T, :B]


# ----------------------------------------------------------------------------
# TRANSFORMER: layer-streamed encoder stack (post-norm, ReLU FFN)
# ----------------------------------------------------------------------------
def _layernorm(x, gamma, beta, eps=1e-5):
    mu = jnp.mean(x, axis=-1, keepdims=True)
    var = jnp.mean((x - mu) ** 2, axis=-1, keepdims=True)
    return (x - mu) * lax.rsqrt(var + eps) * gamma + beta


def transformer_stack(x, stacked, num_heads):
    """Stack of post-norm TransformerEncoderLayers.  x: (B, T, d).
    stacked: 16 arrays, each with leading layer axis; matmul weights in bf16."""
    B, T, d = x.shape
    nh = num_heads
    dh = d // nh
    scale = 1.0 / math.sqrt(dh)
    n_layers = stacked[0].shape[0]

    def kernel(x_ref, wq_r, bq_r, wk_r, bk_r, wv_r, bv_r, wo_r, bo_r,
               w1_r, b1_r, w2_r, b2_r, g1_r, be1_r, g2_r, be2_r, o_ref):
        @pl.when(pl.program_id(1) == 0)
        def _():
            o_ref[0] = x_ref[0]                 # seed the resident activation

        xb = o_ref[0]                           # (T, d), resident across the layer axis
        wq, bq = wq_r[0], bq_r[0]
        wk, bk = wk_r[0], bk_r[0]
        wv, bv = wv_r[0], bv_r[0]
        wo, bo = wo_r[0], bo_r[0]

        # One wide projection per Q/K/V: full MXU N-width, lane-dense results.
        q = _mm(xb, wq) + bq
        k = _mm(xb, wk) + bk
        v = _mm(xb, wv) + bv

        # Per-head split only for score/context; output projection accumulated per head.
        acc = jnp.zeros((T, d), jnp.float32)
        for h in range(nh):
            sl = slice(h * dh, (h + 1) * dh)
            qh, kh, vh = q[:, sl], k[:, sl], v[:, sl]
            s = _mm(qh, kh.T) * scale                       # (T, T)
            s = s - jnp.max(s, axis=-1, keepdims=True)
            p = jnp.exp(s)
            p = p * pl.reciprocal(jnp.sum(p, axis=-1, keepdims=True), approx=True)
            ctx = _mm(p, vh)                                # (T, dh)
            acc = acc + _mm(ctx, wo[sl, :])
        mha = acc + bo
        y = _layernorm(xb + mha, g1_r[0], be1_r[0])
        hdn = jnp.maximum(_mm(y, w1_r[0]) + b1_r[0], 0.0)
        ff = _mm(hdn, w2_r[0]) + b2_r[0]
        o_ref[0] = _layernorm(y + ff, g2_r[0], be2_r[0])

    # TODO(synk): for long T on v7x, add a Tq grid axis with flash-style online softmax
    # so the (T, T) score block stays bounded and the second TensorCore gets work.
    def _layer_spec(p):
        nd = p.ndim
        return pl.BlockSpec((1,) + p.shape[1:],
                            lambda b, l, nd=nd: (l,) + (0,) * (nd - 1))

    in_specs = [pl.BlockSpec((1, T, d), lambda b, l: (b, 0, 0))]
    in_specs += [_layer_spec(p) for p in stacked]
    return pl.pallas_call(
        kernel,
        out_shape=jax.ShapeDtypeStruct((B, T, d), jnp.float32),
        grid=(B, n_layers),
        in_specs=in_specs,
        out_specs=pl.BlockSpec((1, T, d), lambda b, l: (b, 0, 0)),
        compiler_params=pltpu.CompilerParams(
            dimension_semantics=("parallel", "arbitrary"), vmem_limit_bytes=_VMEM_LIMIT),
    )(x, *stacked)


# ----------------------------------------------------------------------------
# ModularBlock wrapper (parameter setup + layout glue in plain JAX)
# ----------------------------------------------------------------------------
class ModularBlockPallas:
    def __init__(self, block_type, in_dim, out_dim, kernel_size, num_heads,
                 num_layers, dropout=0.1, key=None):
        self.block_type = BLOCK_TYPES.get(str(block_type).upper(), "NONE")
        self.in_dim = in_dim
        self.out_dim = out_dim
        self.kernel_size = kernel_size
        self.num_heads = num_heads
        self.num_layers = num_layers
        self.dropout = max(0.0, min(1.0, dropout))  # identity at inference
        key = jax.random.PRNGKey(0) if key is None else key

        if self.block_type == "CNN":
            self.params = [_init_conv1d(key, in_dim, out_dim, kernel_size)]
        elif self.block_type == "TCN":
            self.params, cur = [], in_dim
            for li in range(num_layers):
                self.params.append(_init_conv1d(jax.random.fold_in(key, li),
                                                cur, out_dim, kernel_size))
                cur = out_dim
        elif self.block_type == "MLP":
            # Pad hidden/output feature dims to 128 lanes; slice back in __call__.
            Dp = _round_up(out_dim, 128)
            self._mlp_dp = Dp
            self.params = []
            cur_true, cur_pad = in_dim, in_dim
            for li in range(num_layers):
                w, b = _init_linear(jax.random.fold_in(key, li), cur_true, out_dim)
                wp = jnp.zeros((cur_pad, Dp), jnp.float32).at[:cur_true, :out_dim].set(w)
                bp = jnp.zeros((1, Dp), jnp.float32).at[:, :out_dim].set(b)
                self.params.append((wp.astype(MATMUL_DTYPE), bp))
                cur_true, cur_pad = out_dim, Dp
        elif self.block_type == "GRU":
            self.params, cur = [], in_dim
            H = out_dim
            for li in range(num_layers):
                w_ih, w_hh, b_ih, b_hh = _init_rnn_layer(
                    jax.random.fold_in(key, li), cur, H, gates=3)
                # Fold r/z biases (input+hidden); n keeps input bias hoisted, hidden bias
                # stays inside r*(...).  PyTorch gate order [r, z, n].
                b_in = jnp.concatenate(
                    [b_ih[:, :2 * H] + b_hh[:, :2 * H], b_ih[:, 2 * H:3 * H]], axis=1)
                b_nh = b_hh[:, 2 * H:3 * H]
                self.params.append((w_ih.astype(MATMUL_DTYPE),
                                    w_hh.astype(MATMUL_DTYPE), b_in, b_nh))
                cur = H
        elif self.block_type == "LSTM":
            self.params, cur = [], in_dim
            H = out_dim
            for li in range(num_layers):
                w_ih, w_hh, b_ih, b_hh = _init_rnn_layer(
                    jax.random.fold_in(key, li), cur, H, gates=4)
                self.params.append((w_ih.astype(MATMUL_DTYPE),
                                    w_hh.astype(MATMUL_DTYPE), b_ih + b_hh))
                cur = H
        elif self.block_type == "TRANSFORMER":
            if in_dim % num_heads != 0:
                self.num_heads = 1
            layers = [_init_transformer_layer(jax.random.fold_in(key, li),
                                              in_dim, in_dim * 4)
                      for li in range(num_layers)]
            stacked = [jnp.stack([lp[i] for lp in layers], axis=0) for i in range(16)]
            w_idx = {0, 2, 4, 6, 8, 10}  # matmul weights -> bf16; biases / LN stay f32
            self.params = [s.astype(MATMUL_DTYPE) if i in w_idx else s
                           for i, s in enumerate(stacked)]
        else:
            self.params = None

    def __call__(self, x):
        x = x.astype(jnp.float32)
        if self.block_type == "NONE" or self.params is None:
            return x

        if self.block_type in ("CNN", "TCN"):
            # PyTorch permutes NCL<->NLC around Conv1d; the kernel is NLC natively.
            out = conv_stack_relu(x, self.params, self.kernel_size)
            assert out.shape[-1] == self.out_dim
            return out

        if self.block_type in ("GRU", "LSTM"):
            out = jnp.transpose(x, (1, 0, 2))       # (T, B, D) time-major for the scan
            for p in self.params:
                out = (gru_layer(out, *p) if self.block_type == "GRU"
                       else lstm_layer(out, *p))
            out = jnp.transpose(out, (1, 0, 2))
            assert out.shape[-1] == self.out_dim
            return out

        if self.block_type == "TRANSFORMER":
            return transformer_stack(x, self.params, self.num_heads)

        if self.block_type == "MLP":
            B, T, F = x.shape
            out = mlp_stack_relu(x.reshape(B * T, F), self.params)
            out = out[:, :self.out_dim].reshape(B, T, self.out_dim)
            assert out.shape[-1] == self.out_dim
            return out

        return x


# ----------------------------------------------------------------------------
if __name__ == "__main__":
    B, T, IN_DIM, OUT_DIM = 2, 8, 16, 32
    K, HEADS, LAYERS = 3, 4, 2

    x = jax.random.normal(jax.random.PRNGKey(0), (B, T, IN_DIM), jnp.float32)

    for i, bt in enumerate(["CNN", "TCN", "MLP", "GRU", "LSTM", "TRANSFORMER", "NONE"]):
        blk = ModularBlockPallas(bt, IN_DIM, OUT_DIM, K, HEADS, LAYERS,
                                 dropout=0.1, key=jax.random.PRNGKey(100 + i))
        out = jax.block_until_ready(blk(x))
        exp_dim = IN_DIM if bt in ("NONE", "TRANSFORMER") else OUT_DIM
        assert out.shape == (B, T, exp_dim), (bt, out.shape)
        assert bool(jnp.all(jnp.isfinite(out))), bt

    print("KERNEL_OK")
</pallas_src>

<mosaic_0001>
module attributes {stable_mosaic.version = 11 : i64} {
  func.func @kernel(%arg0: i32, %arg1: memref<1x8x16xf32, #tpu.memory_space<vmem>>, %arg2: memref<3x16x32xbf16, #tpu.memory_space<vmem>>, %arg3: memref<1x32xf32, #tpu.memory_space<vmem>>, %arg4: memref<1x8x32xf32, #tpu.memory_space<vmem>>) attributes {dimension_semantics = [#tpu.dimension_semantics<parallel>], iteration_bounds = array<i64: 2>, scalar_prefetch = 0 : i64, scratch_operands = 0 : i64, tpu.core_type = #tpu.core_type<tc>, window_params = [{transform_indices = @transform_0, window_bounds = array<i64: 1, 8, 16>}, {pipeline_mode = #tpu.pipeline_mode<synchronous>, transform_indices = @transform_1, window_bounds = array<i64: 3, 16, 32>}, {pipeline_mode = #tpu.pipeline_mode<synchronous>, transform_indices = @transform_2, window_bounds = array<i64: 1, 32>}, {transform_indices = @transform_3, window_bounds = array<i64: 1, 8, 32>}]} {
    %c0 = arith.constant 0 : index
    %c0_0 = arith.constant 0 : index
    %c0_1 = arith.constant 0 : index
    %0 = vector.load %arg1[%c0, %c0_0, %c0_1] : memref<1x8x16xf32, #tpu.memory_space<vmem>>, vector<1x8x16xf32>
    %1 = vector.shape_cast %0 : vector<1x8x16xf32> to vector<8x16xf32>
    %cst = arith.constant 0.000000e+00 : f32
    %2 = vector.broadcast %cst : f32 to vector<1x16xf32>
    %3 = tpu.concatenate %2, %1, %2 in 0 : vector<1x16xf32>, vector<8x16xf32>, vector<1x16xf32> -> vector<10x16xf32>
    %4 = vector.extract_strided_slice %3 {offsets = [0, 0], sizes = [8, 16], strides = [1, 1]} : vector<10x16xf32> to vector<8x16xf32>
    %c0_2 = arith.constant 0 : index
    %c0_3 = arith.constant 0 : index
    %c0_4 = arith.constant 0 : index
    %5 = vector.load %arg2[%c0_2, %c0_3, %c0_4] : memref<3x16x32xbf16, #tpu.memory_space<vmem>>, vector<1x16x32xbf16>
    %6 = vector.shape_cast %5 : vector<1x16x32xbf16> to vector<16x32xbf16>
    %7 = arith.truncf %4 : vector<8x16xf32> to vector<8x16xbf16>
    %cst_5 = arith.constant dense<0.000000e+00> : vector<8x32xf32>
    %8 = tpu.matmul %7, %6, %cst_5 {dimension_numbers = #tpu.dot_dimension_numbers<[1], [0], [0], [1], [0, 0, 1, 1], [], []>} : vector<8x16xbf16>, vector<16x32xbf16>, vector<8x32xf32> -> vector<8x32xf32>
    %9 = vector.extract_strided_slice %3 {offsets = [1, 0], sizes = [8, 16], strides = [1, 1]} : vector<10x16xf32> to vector<8x16xf32>
    %c1 = arith.constant 1 : index
    %c0_6 = arith.constant 0 : index
    %c0_7 = arith.constant 0 : index
    %10 = vector.load %arg2[%c1, %c0_6, %c0_7] : memref<3x16x32xbf16, #tpu.memory_space<vmem>>, vector<1x16x32xbf16>
    %11 = vector.shape_cast %10 : vector<1x16x32xbf16> to vector<16x32xbf16>
    %12 = arith.truncf %9 : vector<8x16xf32> to vector<8x16xbf16>
    %cst_8 = arith.constant dense<0.000000e+00> : vector<8x32xf32>
    %13 = tpu.matmul %12, %11, %cst_8 {dimension_numbers = #tpu.dot_dimension_numbers<[1], [0], [0], [1], [0, 0, 1, 1], [], []>} : vector<8x16xbf16>, vector<16x32xbf16>, vector<8x32xf32> -> vector<8x32xf32>
    %14 = arith.addf %8, %13 : vector<8x32xf32>
    %15 = vector.extract_strided_slice %3 {offsets = [2, 0], sizes = [8, 16], strides = [1, 1]} : vector<10x16xf32> to vector<8x16xf32>
    %c2 = arith.constant 2 : index
    %c0_9 = arith.constant 0 : index
    %c0_10 = arith.constant 0 : index
    %16 = vector.load %arg2[%c2, %c0_9, %c0_10] : memref<3x16x32xbf16, #tpu.memory_space<vmem>>, vector<1x16x32xbf16>
    %17 = vector.shape_cast %16 : vector<1x16x32xbf16> to vector<16x32xbf16>
    %18 = arith.truncf %15 : vector<8x16xf32> to vector<8x16xbf16>
    %cst_11 = arith.constant dense<0.000000e+00> : vector<8x32xf32>
    %19 = tpu.matmul %18, %17, %cst_11 {dimension_numbers = #tpu.dot_dimension_numbers<[1], [0], [0], [1], [0, 0, 1, 1], [], []>} : vector<8x16xbf16>, vector<16x32xbf16>, vector<8x32xf32> -> vector<8x32xf32>
    %20 = arith.addf %14, %19 : vector<8x32xf32>
    %c0_12 = arith.constant 0 : index
    %c0_13 = arith.constant 0 : index
    %21 = vector.load %arg3[%c0_12, %c0_13] : memref<1x32xf32, #tpu.memory_space<vmem>>, vector<1x32xf32>
    %22 = vector.broadcast %21 : vector<1x32xf32> to vector<8x32xf32>
    %23 = arith.addf %20, %22 : vector<8x32xf32>
    %cst_14 = arith.constant 0.000000e+00 : f32
    %24 = vector.broadcast %cst_14 : f32 to vector<8x32xf32>
    %25 = arith.maximumf %23, %24 : vector<8x32xf32>
    %c0_15 = arith.constant 0 : index
    %c0_16 = arith.constant 0 : index
    %c0_17 = arith.constant 0 : index
    %26 = vector.load %arg4[%c0_15, %c0_16, %c0_17] : memref<1x8x32xf32, #tpu.memory_space<vmem>>, vector<1x8x32xf32>
    %27 = vector.shape_cast %26 : vector<1x8x32xf32> to vector<8x32xf32>
    %28 = vector.shape_cast %25 : vector<8x32xf32> to vector<1x8x32xf32>
    tpu.vector_store %arg4[%c0_15, %c0_16, %c0_17], %28 {strides = array<i32>} : memref<1x8x32xf32, #tpu.memory_space<vmem>>, vector<1x8x32xf32>,
    return
  }
  func.func @transform_0(%arg0: i32) -> (i32, i32, i32) {
    %c0_i32 = arith.constant 0 : i32
    %c0_i32_0 = arith.constant 0 : i32
    %c0_i32_1 = arith.constant 0 : i32
    return %arg0, %c0_i32, %c0_i32_0 : i32, i32, i32
  }
  func.func @transform_1(%arg0: i32) -> (i32, i32, i32) {
    %c0_i32 = arith.constant 0 : i32
    %c0_i32_0 = arith.constant 0 : i32
    %c0_i32_1 = arith.constant 0 : i32
    %c0_i32_2 = arith.constant 0 : i32
    return %c0_i32, %c0_i32_0, %c0_i32_1 : i32, i32, i32
  }
  func.func @transform_2(%arg0: i32) -> (i32, i32) {
    %c0_i32 = arith.constant 0 : i32
    %c0_i32_0 = arith.constant 0 : i32
    %c0_i32_1 = arith.constant 0 : i32
    return %c0_i32, %c0_i32_0 : i32, i32
  }
  func.func @transform_3(%arg0: i32) -> (i32, i32, i32) {
    %c0_i32 = arith.constant 0 : i32
    %c0_i32_0 = arith.constant 0 : i32
    %c0_i32_1 = arith.constant 0 : i32
    return %arg0, %c0_i32, %c0_i32_0 : i32, i32, i32
  }
}

</mosaic_0001>

<bundles_post_ra>
// kernel: tpu_custom_call.1
= control target key start
LH: loop header
LB: loop body
LE: loop exit
PB: predicated region body
PF: predicated region fallthrough
CT: control target
= control target key end

     0   :  { %8 = vsyncpa [#allocation3], 0  ;;  %s912_s0 = inlined_call_operand.hbm [shape: f32[2,8,16], index: 0, kind: input, shape index: {}]   ;;  %s913_s1 = inlined_call_operand.hbm [shape: bf16[3,16,32], index: 1, kind: input, shape index: {}]   ;;  %s914_s2 = inlined_call_operand.vmem [shape: f32[1,32], index: 2, kind: input, shape index: {}]   ;;  %s915_s3 = inlined_call_operand.hbm [shape: f32[2,8,32], index: 3, kind: output, shape index: {}]  }
   0x1   :  { %10 = vsyncpa [#allocation3 + $0x1], 0 }
   0x2   :  { %11 = vsyncpa [#allocation6], 0 }
   0x3   :  { %12 = vsyncpa [#allocation4], 0 }
   0x4   :  { %14 = vsyncpa [#allocation4 + $0x1], 0  ;;  %s742_s12 = smov 0   ;;  %s744_s13 = smov 0  }
   0x5   :  { %s746_s14 = smov 0   ;;  %s748_s15 = smov 0  }
   0x6 LB: > { %s763_s16 = sadd.s32 4294967295, %s713_s15   ;;  %s482_s17 = sadd.s32 4294967294, %s713_s15   ;;  %s713_s15 = sphi %s748_s15, %s937_s15   ;;  %s709_s14 = sphi %s746_s14, %s936_s14   ;;  %s705_s13 = sphi %s744_s13, %s935_s13   ;;  %s701_s12 = sphi %s742_s12, %s934_s12  }
   0x7   : > { %p40_p0 = scmp.ne.s32.totalorder %s705_s13, %s701_s12  ;;  %p916_p1 = scmp.eq.s32.totalorder %s763_s16, 0 }
   0x8   : > { %p112_p3 = scmp.eq.s32.totalorder %s482_s17, 1  ;;  %p483_p5 = scmp.ge.s32.totalorder %s713_s15, 1 }
   0x9   : > { %p772_p4 = por %p916_p1, %p40_p0  ;;  %p119_p7 = scmp.lt.s32.totalorder %s713_s15, 3 }
   0xa   : > { %p777_p6 = por %p112_p3, %p40_p0  ;;  %s715_s21 = smov [#allocation5]  }
   0xb   : > { %s920_s18 = scalar_select %p772_p4, 1, 0 }
   0xc   : > { %s921_s19 = scalar_select %p777_p6, 1, 0 }
   0xd   : > { %p782_p8 = pnand %p483_p5, %p119_p7  ;;  %s131_s22 = sshll.u32 %s715_s21, 4  ;;  %s132_s22 = int_to_ptr.vmem [resolvable:$true] %s131_s22 }
   0xe   : > { %s796_s24 = sadd.s32 1, %s713_s15   ;;  %s27_s25 = sadd.s32 1, %s709_s14 }
   0xf   : > { %s922_s20 = scalar_select %p782_p8, 1, 0 }
  0x10   : > { %p535_p9 = pneg %p782_p8  ;;  %s24_s26 = ssub.s32 %s713_s15, %s796_s24 }
  0x11   : > { %s602_s27 = scalar_lea.vmem %s132_s22, 384  ;;  %p610_p5 = scmp.lt.s32.totalorder %s132_s22, %s132_s22 }
  0x12   : > { %p791_p11 = pnand %p535_p9, %p916_p1  ;;  %p603_p13 = scmp.ne.s32.totalorder %s132_s22, %s602_s27 }
  0x13   : > { %p611_p7 = scmp.lt.s32.totalorder %s602_s27, %s602_s27 }
  0x14   : > { %p593_p12 = pneg %p791_p11 }
  0x15   : > { %p612_p10 = por %p611_p7, %p610_p5 }
  0x16   : > { %p605_p0 = pnand %p603_p13, %p593_p12 }
  0x18   : > { %p606_p3 = pneg %p605_p0 }
  0x1a   : > { %p613_p2 = pnand %p612_p10, %p606_p3 }
  0x1c   : > { %616 = shalt.err (!%p613_p2)
}
  0x1d   : > { %s716_s28 = smov 64   ;;  %s717_s29 = smov 4  }
  0x1e   : > { %538 = dma.hbm_to_vmem [thread:$0]  (!%p791_p11), %s913_s1, 384, %s132_s22, [#allocation6], %s716_s28, %s716_s28, %s717_s29  }
  0x1f   : > { %p25_p9 = scmp.eq.s32.totalorder %s24_s26, 0  ;;  %p34_p12 = scmp.ne.s32.totalorder %s709_s14, %s705_s13 }
  0x20   : > { %p35_p10 = scmp.eq.s32.totalorder %s713_s15, 0  ;;  %p548_p2 = scmp.lt.s32.totalorder %s713_s15, 2 }
  0x21   : > { %s813_s5 = scalar_select %p25_p9, %s709_s14, %s27_s25  }
  0x22   : > { %p36_p13 = por %p35_p10, %p34_p12  ;;  %p924_p0 = scmp.eq.s32.totalorder %s763_s16, 1 }
  0x23   : > { %s148_s7 = sand.u32 1, %s709_s14   ;;  %s487_s8 = sshll.u32 %s713_s15, 7 }
  0x24   : > { %p817_p3 = por %p924_p0, %p34_p12  ;;  %s486_s9 = sshll.u32 %s148_s7, 3 }
  0x25   : > { %s826_s17 = scalar_lea.hbm %s912_s0, %s487_s8  ;;  %s152_s21 = scalar_lea.vmem [#allocation2], %s486_s9 }
  0x26   : > { %s925_s6 = scalar_select %p817_p3, 1, 0 }
  0x27   : > { %s159_s22 = sshll.u32 %s152_s21, 4  ;;  %p828_p11 = pnand %p548_p2, %p36_p13  ;;  %s160_s22 = int_to_ptr.vmem [resolvable:$true] %s159_s22 }
  0x28   : > { %s149_s25 = scalar_lea.sflag [#allocation3], %s148_s7  ;;  %s617_s26 = scalar_lea.hbm %s826_s17, 128 }
  0x29   : > { %p618_p5 = scmp.ne.s32.totalorder %s826_s17, %s617_s26  ;;  %p619_p7 = pneg %p828_p11 }
  0x2a   : > { %s622_s29 = scalar_lea.hbm %s912_s0, 256  ;;  %p623_p10 = scmp.lt.s32.totalorder %s826_s17, %s912_s0 }
  0x2b   : > { %p620_p9 = pnand %p619_p7, %p618_p5  ;;  %p624_p2 = scmp.lt.s32.totalorder %s622_s29, %s617_s26 }
  0x2d   : > { %p621_p12 = pneg %p620_p9  ;;  %p625_p13 = por %p624_p2, %p623_p10 }
  0x2f   : > { %p626_p0 = pnand %p625_p13, %p621_p12 }
  0x31   : > { %629 = shalt.err (!%p626_p0)
}
  0x32   : > { %s630_s8 = scalar_lea.vmem %s160_s22, 128  ;;  %s718_s7 = smov [#allocation2]  }
  0x33   : > { %p631_p1 = scmp.ne.s32.totalorder %s160_s22, %s630_s8  ;;  %s635_s9 = sshll.u32 %s718_s7, 4  ;;  %s636_s9 = int_to_ptr.vmem [resolvable:$false] %s635_s9 }
  0x34   : > { %s637_s10 = scalar_lea.vmem %s636_s9, 256  ;;  %p638_p5 = scmp.lt.s32.totalorder %s160_s22, %s636_s9 }
  0x35   : > { %p633_p6 = pnand %p631_p1, %p619_p7  ;;  %p639_p9 = scmp.lt.s32.totalorder %s637_s10, %s630_s8 }
  0x37   : > { %p634_p3 = pneg %p633_p6  ;;  %p640_p4 = por %p639_p9, %p638_p5 }
  0x39   : > { %p641_p8 = pnand %p640_p4, %p634_p3 }
  0x3b   : > { %644 = shalt.err (!%p641_p8)
}
  0x3c   : > { %542 = dma.hbm_to_vmem [thread:$0]  (!%p828_p11), %s826_s17, 128, %s160_s22, %s149_s25  }
  0x3d   : > { %p927_p12 = scmp.ne.s32.totalorder %s922_s20, 0 }
  0x3e   : > { %s849_s11 = sand.u32 (!%p927_p12), 1, %s705_s13   ;;  %p928_p1 = scmp.ne.s32.totalorder (!%p927_p12), %s920_s18, 0 }
  0x3f   : > { %168 = sbr.rel (%p927_p12) target bundleno = 304 (0x130), region = 32  ;;  %s489_s21 = sshll.u32 (!%p927_p12), %s849_s11, 3 }
  0x40   : > { %s171_s26 = scalar_lea.sflag (!%p927_p12), [#allocation3], %s849_s11  ;;  %s174_s27 = scalar_lea.vmem (!%p927_p12), [#allocation2], %s489_s21 }
  0x44   : > { %688 = dma.done.wait (%p928_p1), %s171_s26, 128  }
  0x45   : > { %690 = vsyncadd (%p928_p1), %s171_s26, 4294967168  ;;  %p929_p4 = scmp.eq.s32.totalorder %s763_s16, 0 }
  0x47   : > { %692 = dma.done.wait (%p929_p4), [#allocation6], 384   ;;  %p930_p6 = pmov %p929_p4 }
  0x48   : > { %v719_v0 = vmov 0.0   ;;  %vm720_vm0 = vmmov 0   ;;  %v588_v1 = vld [vmem:[#allocation5 + $0x8] sm:$0xff]   ;;  %v589_v2 = vld [vmem:[#allocation5] sm:$0xff]   ;;  %v202_v3 = vld [vmem:[%s174_s27] sm:$0xff]  ;;  %vm206_vm1 = vcmask 1040384  }
  0x49   : > { %694 = vsyncadd (%p930_p6), [#allocation6], 4294966912  ;;  %509 = vmatprep.subr.bf16.mxu0 %v719_v0  ;;  %515 = vmatprep.subr.bf16.mxu1 %v719_v0  ;;  %v204_v4 = vrot.slane %v202_v3, 7  ;;  %vm229_vm2 = vcmask 130048   ;;  %v590_v12 = vld [vmem:[#allocation5 + $0x10] sm:$0xff]   ;;  %s500_s17 = sshll.u32 %s763_s16, 7 }
  0x4a   : > { %511 = vmatprep.mubr.msk.bf16.mxu0 %vm720_vm0, %v719_v0  ;;  %517 = vmatprep.mubr.msk.bf16.mxu1 %vm720_vm0, %v719_v0  ;;  %v498_v25 = vld [vmem:[%s914_s2] ss:$0 sm:$0xff]  ;;  %s200_s22 = scalar_lea.vmem [#allocation7], %s489_s21  ;;  %vm386_vm3 = vcmask 261120   ;;  %s875_s29 = scalar_lea.hbm %s915_s3, %s500_s17 }
  0x4b   : > { %510 = vmatpush3.bf16.msra.mxu0 %v588_v1  ;;  %516 = vmatpush3.bf16.msra.mxu1 %v589_v2  ;;  %v207_v5 = vsel %vm206_vm1, 0.0, %v204_v4  ;;  %v208_v6 = vsel %vm206_vm1, %v204_v4, 0.0  ;;  %s402_s23 = sshll.u32 %s200_s22, 4  ;;  %s389_s30 = scalar_lea.sflag [#allocation4], %s849_s11  ;;  %s403_s23 = int_to_ptr.vmem [resolvable:$true] %s402_s23 }
  0x4c   : > { %521 = vmatprep.subr.bf16.mxu0 %v719_v0  ;;  %v215_v7 = vpack.c.bf16 %v208_v6, %v207_v5  ;;  %v211_v8 = vpack.c.bf16 %v207_v5, %v207_v5  ;;  %s645_s4 = scalar_lea.vmem %s403_s23, 128  ;;  %p931_p3 = scmp.ne.s32.totalorder %s925_s6, 0 }
  0x4d   : > { %p646_p8 = scmp.ne.s32.totalorder %s403_s23, %s645_s4  ;;  %s721_s16 = smov [#allocation7]  }
  0x4e   : > { %v217_v9 = vshrl.u32 %v215_v7, 16  ;;  %v219_v10 = vshll.u32 %v215_v7, 16  ;;  %518 = vmatmul.mubr.msk.bf16.vlgmr.msra.gmra.mxu1 %vm229_vm2, %v211_v8  ;;  %v326_v14 = vrot.slane %v215_v7, 1  ;;  %s649_s8 = sshll.u32 %s721_s16, 4  ;;  %s650_s8 = int_to_ptr.vmem [resolvable:$false] %s649_s8 }
  0x4f   : > { %p647_p11 = pnand %p646_p8, %p931_p3  ;;  %s651_s7 = scalar_lea.vmem %s650_s8, 256 }
  0x50   : > { %v221_v11 = vrot.slane %v219_v10, 1  ;;  %p652_p10 = scmp.lt.s32.totalorder %s403_s23, %s650_s8  ;;  %p653_p2 = scmp.lt.s32.totalorder %s651_s7, %s645_s4 }
  0x51   : > { %p648_p7 = pneg %p647_p11 }
  0x52   : > { %v222_v13 = vor.u32 %v221_v11, %v217_v9  ;;  %p654_p13 = por %p653_p2, %p652_p10 }
  0x54   : > { %512 = vmatmul.mubr.msk.bf16.vlgmr.msra.gmra.mxu0 %vm229_vm2, %v222_v13  ;;  %p655_p0 = pnand %p654_p13, %p648_p7 }
  0x55   : > { %522 = vmatpush3.bf16.msra.mxu0 %v590_v12  ;;  %523 = vmatprep.mubr.msk.bf16.mxu0 %vm720_vm0, %v719_v0 }
  0x5c   : > { %524 = vmatmul.mubr.msk.bf16.vlgmr.msra.gmra.mxu0 %vm229_vm2, %v326_v14 }
 0x10e   : > { %v316_v15 = vpop.f32.mrf.mxu1 }
 0x110   : > { %v519_v16 = vpop.f32.mrf.mxu1 }
 0x112   : > { %v319_v17 = vpop.f32.mrf.mxu1 }
 0x114   : > { %v267_v18 = vpop.f32.mrf.mxu0  ;;  %v520_v19 = vpop.f32.mrf.mxu1 }
 0x115   : > { %v317_v23 = vadd.f32 %v316_v15, %v267_v18 }
 0x116   : > { %v513_v20 = vpop.f32.mrf.mxu0 }
 0x118   : > { %v270_v21 = vpop.f32.mrf.mxu0 }
 0x11a   : > { %v514_v22 = vpop.f32.mrf.mxu0 }
 0x11c   : > { %v370_v24 = vpop.f32.mrf.mxu0 }
 0x11d   : > { %v376_v26 = vadd.f32 %v370_v24, %v317_v23 }
 0x11e   : > { %v525_v27 = vpop.f32.mrf.mxu0 }
 0x11f   : > { %v384_v28 = vadd.f32 %v498_v25, %v376_v26 }
 0x120   : > { %v373_v29 = vpop.f32.mrf.mxu0 }
 0x121   : > { %v385_v30 = vmax.f32 %v384_v28, 0.0 }
 0x122   : > { %v526_v31 = vpop.f32.mrf.mxu0 }
 0x123   : > { %387 = vst.msk [vmem:[%s200_s22] sm:$0xff] %vm386_vm3, %v385_v30 }
 0x124   : > { %658 = shalt.err (!%p655_p0)
}
 0x125   : > { %s659_s9 = scalar_lea.hbm %s875_s29, 128  ;;  %s663_s21 = scalar_lea.hbm %s915_s3, 256 }
 0x126   : > { %p660_p5 = scmp.ne.s32.totalorder %s875_s29, %s659_s9  ;;  %p664_p1 = scmp.lt.s32.totalorder %s875_s29, %s915_s3 }
 0x127   : > { %p665_p4 = scmp.lt.s32.totalorder %s663_s21, %s659_s9 }
 0x128   : > { %p661_p9 = pnand %p660_p5, %p931_p3 }
 0x129   : > { %p666_p6 = por %p665_p4, %p664_p1 }
 0x12a   : > { %p662_p12 = pneg %p661_p9 }
 0x12c   : > { %p667_p8 = pnand %p666_p6, %p662_p12 }
 0x12e   : > { %670 = shalt.err (!%p667_p8)
}
 0x12f   : > { %533 = dma.vmem_to_hbm [thread:$0]  (%p931_p3), %s403_s23, 128, %s875_s29, %s389_s30  }
 0x130 PF: > { %s414_s18 = sand.u32 1, %s701_s12   ;;  %p932_p11 = scmp.ne.s32.totalorder %s921_s19, 0 }
 0x131   : > { %p933_p7 = scmp.ge.s32.totalorder %s713_s15, 2  ;;  %s415_s20 = scalar_lea.sflag [#allocation4], %s414_s18 }
 0x133   : > { %p544_p10 = pnand %p933_p7, %p932_p11 }
 0x135   : > { %p545_p2 = pneg %p544_p10 }
 0x137   : > { %696 = dma.done.wait (%p545_p2), %s415_s20, 128  }
 0x138   : > { %698 = vsyncadd (%p545_p2), %s415_s20, 4294967168  ;;  %p17_p13 = scmp.ge.s32.totalorder %s796_s24, 4   ;;  %s934_s12 = smov %s705_s13 }
 0x139   : > { %s935_s13 = smov %s709_s14  ;;  %s936_s14 = smov %s813_s5 }
 0x13a   : > { %s937_s15 = smov %s796_s24  ;;  %19 = sbr.rel (!%p17_p13) target bundleno = 6 (0x6), region = 83 }
 0x13f   :  { %420 = vsyncpa [#allocation3], 1 }
 0x140   :  { %422 = vsyncpa [#allocation3 + $0x1], 1 }
 0x141   :  { %423 = vsyncpa [#allocation6], 1 }
 0x142   :  { %424 = vsyncpa [#allocation4], 1 }
 0x143   :  { %426 = vsyncpa [#allocation4 + $0x1], 1 }

</bundles_post_ra>
